<compile_context>
chip_gen: v7x
topology: tpu7x:2x2x1
jax: 0.10.0
libtpu: 0.0.40
codegen_flags: <defaults>
</compile_context>

<pallas_src>
import jax
import jax.numpy as jnp
from jax.experimental import pallas as pl
from jax.experimental.pallas import tpu as pltpu


def _shard_chain_kernel(x_ref, w_ref, b_ref, o_ref, act_ref):
    """One fused grid step: layer l, output N-tile n.

    x_ref  : (B, H)          shard input (constant block index -> DMA'd once)
    w_ref  : (H, tn)         full-K bf16 weight block for (layer l, N-tile n)
    b_ref  : (1, tn)         f32 bias tile for (layer l, N-tile n)
    o_ref  : (B, tn)         output tile (only written on the last layer)
    act_ref: (2, nt, B, tn)  bf16 resident ping-pong activation banks
    """
    l = pl.program_id(0)
    n = pl.program_id(1)
    num_l = pl.num_programs(0)

    nt = act_ref.shape[1]          # static
    tn = act_ref.shape[3]          # static
    parity = l % 2

    # Stage the shard input into activation bank 0 exactly once, chunked by
    # N-tile so later reads are plain leading-dim indexing (no lane slicing).
    @pl.when((l == 0) & (n == 0))
    def _():
        for kk in range(nt):
            act_ref[0, kk] = x_ref[:, kk * tn:(kk + 1) * tn].astype(act_ref.dtype)

    # Full-K matmul against this layer's resident activation: static K-chunk
    # loop, f32 accumulation, no reduction grid axis and no acc scratch.
    acc = jnp.zeros((x_ref.shape[0], tn), jnp.float32)
    for kk in range(nt):
        acc += jnp.dot(act_ref[parity, kk],
                       w_ref[kk * tn:(kk + 1) * tn, :],
                       preferred_element_type=jnp.float32)

    # Bias + ReLU epilogue in f32, then park bf16 in the other bank for the
    # next layer.
    y = jnp.maximum(acc + b_ref[...], 0.0)
    act_ref[1 - parity, n] = y.astype(act_ref.dtype)

    # Only the last layer's tiles leave the kernel (out block index only walks
    # N on the last layer, so non-final layers never write back to HBM).
    @pl.when(l == num_l - 1)
    def _():
        o_ref[...] = y.astype(o_ref.dtype)


# 48 MiB is a safe explicit scoped-VMEM budget on every generation
# (v5e/v6e: 128 MiB physical; v7x: 64 MiB physical).
_DEFAULT_VMEM_BUDGET = 48 * 1024 * 1024


def _vmem_bytes(B, H, tn, x_itemsize, out_itemsize):
    """Conservative VMEM estimate for a given N-tile width."""
    Bp = max(B, 8)
    nt = H // tn
    return (2 * H * tn * 2              # double-buffered full-K bf16 weight block
            + 2 * Bp * H * x_itemsize   # x block (constant index; conservative x2)
            + 2 * Bp * tn * out_itemsize  # output tile double buffer
            + 2 * 8 * tn * 4            # bias tile (sublane padded)
            + 2 * nt * Bp * tn * 2)     # resident ping-pong bf16 activations


def _pick_tile(B, H, x_itemsize, out_itemsize, max_tile, budget):
    """Largest lane-aligned N-tile (divisor of H) that fits the VMEM budget."""
    cands = [H] + [c for c in (1024, 512, 256, 128) if c < H and H % c == 0]
    if max_tile is not None:
        capped = [c for c in cands if c <= max_tile]
        cands = capped if capped else [min(cands)]
    cands = sorted(set(cands), reverse=True)
    for t in cands:
        if _vmem_bytes(B, H, t, x_itemsize, out_itemsize) <= 0.8 * budget:
            return t
    return cands[-1]


def linear_relu_chain(x, w_stack, b_stack, *, max_tile=None,
                      vmem_budget_bytes=_DEFAULT_VMEM_BUDGET):
    """Run the whole Linear+ReLU chain in ONE pallas_call.

    x:[B,H], w_stack:[L,H,H], b_stack:[L,1,H].  Returns [B,H] in x.dtype.
    """
    B, H = x.shape
    L, Hin, Hout = w_stack.shape
    assert Hin == H and Hout == H, "fused shard chain requires equal-width square layers"
    assert b_stack.shape == (L, 1, H)

    tn = _pick_tile(B, H, x.dtype.itemsize, x.dtype.itemsize,
                    max_tile, vmem_budget_bytes)
    nt = H // tn

    # bf16 weights halve weight-HBM traffic (the kernel is weight-DMA bound at
    # small B); block-major [L, nt, H, tn] makes each full-K weight block one
    # contiguous DMA burst.  Accumulation stays f32 inside the kernel.
    w_blocked = (w_stack.astype(jnp.bfloat16)
                 .reshape(L, H, nt, tn).transpose(0, 2, 1, 3))
    b_f32 = b_stack.astype(jnp.float32)

    # Output block index only walks N on the final layer; earlier layers stick
    # to (0,0) so no stale tiles are ever written back.
    out_index = lambda l, n, L=L: (0, jnp.where(l == L - 1, n, 0))

    return pl.pallas_call(
        _shard_chain_kernel,
        out_shape=jax.ShapeDtypeStruct((B, H), x.dtype),
        grid_spec=pltpu.PrefetchScalarGridSpec(
            num_scalar_prefetch=0,
            grid=(L, nt),  # (layer, N tiles); full K reduction done in-kernel
            in_specs=[
                pl.BlockSpec((B, H), lambda l, n: (0, 0)),          # x: fetched once
                pl.BlockSpec((pl.Squeezed(), pl.Squeezed(), H, tn),
                             lambda l, n: (l, n, 0, 0)),            # contiguous weight block
                pl.BlockSpec((pl.Squeezed(), 1, tn),
                             lambda l, n: (l, 0, n)),               # bias tile
            ],
            out_specs=pl.BlockSpec((B, tn), out_index),
            scratch_shapes=[
                pltpu.VMEM((2, nt, B, tn), jnp.bfloat16),           # ping-pong activations
            ],
        ),
        compiler_params=pltpu.CompilerParams(
            # Layer axis is a strict sequential dependency; the activation
            # bank is core-private, so N cannot be megacore-split either.
            dimension_semantics=("arbitrary", "arbitrary"),
            vmem_limit_bytes=int(vmem_budget_bytes),
        ),
    )(x, w_blocked, b_f32)


def chain_arg_fn(output, args, kwargs):
    """Canonical pipeline arg_fn: feed each layer's output to the next layer."""
    return (output,), kwargs


class ShardJAX:
    """JAX mirror of the PyTorch `Shard` container: runs `layers` sequentially,
    threading each output through `arg_fn`, and returns (args, kwargs)."""

    def __init__(self, layers, arg_fn):
        self.layers = layers
        self.arg_fn = arg_fn

    def forward(self, *args, **kwargs):
        output = None
        for layer in self.layers:
            output = layer(*args, **kwargs)
            args, kwargs = self.arg_fn(output, args, kwargs)
        return (args, kwargs)

    __call__ = forward


class LinearReLULayer:
    """One shard layer y = relu(x @ w + b), backed by the fused kernel with L=1."""

    def __init__(self, w, b):
        self.w = w   # (H, H)
        self.b = b   # (1, H)

    def __call__(self, x):
        return linear_relu_chain(x, self.w[None], self.b[None])


class FusedLinearReLUShard(ShardJAX):
    """Shard specialized to a Linear+ReLU chain with the canonical output-chaining
    arg_fn: the entire layer loop runs as ONE pallas_call (contiguous full-K
    weight blocks streamed layer by layer, activations resident in VMEM)."""

    def __init__(self, params, arg_fn=chain_arg_fn, max_tile=None):
        super().__init__([LinearReLULayer(w, b) for (w, b) in params], arg_fn)
        self._w_stack = jnp.stack([w for (w, _) in params])   # (L, H, H)
        self._b_stack = jnp.stack([b for (_, b) in params])   # (L, 1, H)
        self._max_tile = max_tile

    def forward(self, *args, **kwargs):
        if self.arg_fn is chain_arg_fn and len(args) == 1 and not kwargs:
            output = linear_relu_chain(args[0], self._w_stack, self._b_stack,
                                       max_tile=self._max_tile)
            args, kwargs = self.arg_fn(output, args, kwargs)
            return (args, kwargs)
        # General arg_fn / kwargs: fall back to the faithful per-layer loop.
        return super().forward(*args, **kwargs)

    __call__ = forward


if __name__ == "__main__":
    key = jax.random.PRNGKey(0)

    B = 8            # batch rows (raise toward >=256 in real use to fill the MXU)
    H = 256          # hidden width (lane-aligned)
    NUM_LAYERS = 3

    keys = jax.random.split(key, 2 * NUM_LAYERS + 1)
    params = []
    for i in range(NUM_LAYERS):
        w = jax.random.normal(keys[2 * i], (H, H), jnp.float32) * (1.0 / jnp.sqrt(H))
        b = jax.random.normal(keys[2 * i + 1], (1, H), jnp.float32) * 0.01
        params.append((w, b))
    x = jax.random.normal(keys[-1], (B, H), jnp.float32)

    shard = FusedLinearReLUShard(params, chain_arg_fn)
    run = jax.jit(lambda xx: shard(xx)[0][0])
    result = jax.block_until_ready(run(x))

    # Reference emulating the kernel's numerics: bf16 matmul operands, f32
    # accumulation, f32 bias+ReLU epilogue, bf16 inter-layer activations.
    act = x
    y = None
    for (w, b) in params:
        y = jnp.maximum(
            jnp.dot(act.astype(jnp.bfloat16), w.astype(jnp.bfloat16),
                    preferred_element_type=jnp.float32) + b, 0.0)
        act = y.astype(jnp.bfloat16)
    ref = y
    assert jnp.allclose(result, ref, atol=1e-2, rtol=1e-2), "fused shard mismatch vs ref"

    # Exercise the multi-tile path (nt > 1: per-tile output indexing, banked
    # activations, static K-chunked reduction).
    ws = jnp.stack([w for (w, _) in params])
    bs = jnp.stack([b for (_, b) in params])
    result_tiled = jax.block_until_ready(
        jax.jit(lambda xx: linear_relu_chain(xx, ws, bs, max_tile=128))(x))
    assert jnp.allclose(result_tiled, ref, atol=1e-2, rtol=1e-2), "tiled path mismatch vs ref"

    # Also exercise the faithful per-layer fallback path (generic Shard loop).
    generic = ShardJAX([LinearReLULayer(w, b) for (w, b) in params], chain_arg_fn)
    (g_args, _) = generic(x)
    assert jnp.allclose(result, g_args[0], atol=1e-2, rtol=1e-2), "fused vs per-layer mismatch"

    print("KERNEL_OK")
</pallas_src>

<mosaic_0001>
module attributes {stable_mosaic.version = 11 : i64} {
  func.func @_shard_chain_kernel(%arg0: i32, %arg1: i32, %arg2: memref<8x256xf32, #tpu.memory_space<vmem>>, %arg3: memref<1x1x256x256xbf16, #tpu.memory_space<vmem>>, %arg4: memref<1x1x256xf32, #tpu.memory_space<vmem>>, %arg5: memref<8x256xf32, #tpu.memory_space<vmem>>, %arg6: memref<2x1x8x256xbf16, #tpu.memory_space<vmem>>) attributes {dimension_semantics = [#tpu.dimension_semantics<arbitrary>, #tpu.dimension_semantics<arbitrary>], iteration_bounds = array<i64: 3, 1>, scalar_prefetch = 0 : i64, scratch_operands = 1 : i64, tpu.core_type = #tpu.core_type<tc>, window_params = [{pipeline_mode = #tpu.pipeline_mode<synchronous>, transform_indices = @transform_0, window_bounds = array<i64: 8, 256>}, {transform_indices = @transform_1, window_bounds = array<i64: 1, 1, 256, 256>}, {transform_indices = @transform_2, window_bounds = array<i64: 1, 1, 256>}, {transform_indices = @transform_3, window_bounds = array<i64: 8, 256>}]} {
    %c2_i32 = arith.constant 2 : i32
    %c0_i32 = arith.constant 0 : i32
    %0 = arith.cmpi eq, %c2_i32, %c0_i32 : i32
    %c1_i32 = arith.constant 1 : i32
    %1 = arith.select %0, %c1_i32, %c2_i32 : i32
    %2 = arith.remsi %arg0, %1 : i32
    %c0_i32_0 = arith.constant 0 : i32
    %3 = arith.cmpi ne, %2, %c0_i32_0 : i32
    %c0_i32_1 = arith.constant 0 : i32
    %4 = arith.cmpi slt, %2, %c0_i32_1 : i32
    %c0_i32_2 = arith.constant 0 : i32
    %5 = arith.cmpi slt, %1, %c0_i32_2 : i32
    %6 = arith.xori %4, %5 : i1
    %7 = arith.andi %6, %3 : i1
    %8 = arith.addi %2, %1 : i32
    %9 = arith.select %7, %8, %2 : i32
    %c0_i32_3 = arith.constant 0 : i32
    %10 = arith.cmpi eq, %arg0, %c0_i32_3 : i32
    %c0_i32_4 = arith.constant 0 : i32
    %11 = arith.cmpi eq, %arg1, %c0_i32_4 : i32
    %12 = arith.andi %10, %11 : i1
    %13 = arith.extui %12 : i1 to i32
    %c0_i32_5 = arith.constant 0 : i32
    %14 = arith.cmpi ne, %13, %c0_i32_5 : i32
    scf.if %14 {
      %c0_22 = arith.constant 0 : index
      %c0_23 = arith.constant 0 : index
      %39 = vector.load %arg2[%c0_22, %c0_23] : memref<8x256xf32, #tpu.memory_space<vmem>>, vector<8x256xf32>
      %40 = arith.truncf %39 : vector<8x256xf32> to vector<8x256xbf16>
      %c0_24 = arith.constant 0 : index
      %c0_25 = arith.constant 0 : index
      %c0_26 = arith.constant 0 : index
      %c0_27 = arith.constant 0 : index
      %41 = vector.load %arg6[%c0_24, %c0_25, %c0_26, %c0_27] : memref<2x1x8x256xbf16, #tpu.memory_space<vmem>>, vector<1x1x8x256xbf16>
      %42 = vector.shape_cast %41 : vector<1x1x8x256xbf16> to vector<8x256xbf16>
      %43 = vector.shape_cast %40 : vector<8x256xbf16> to vector<1x1x8x256xbf16>
      tpu.vector_store %arg6[%c0_24, %c0_25, %c0_26, %c0_27], %43 {strides = array<i32>} : memref<2x1x8x256xbf16, #tpu.memory_space<vmem>>, vector<1x1x8x256xbf16>,
    } else {
    }
    %cst = arith.constant 0.000000e+00 : f32
    %15 = vector.broadcast %cst : f32 to vector<8x256xf32>
    %16 = arith.index_cast %9 : i32 to index
    %c0 = arith.constant 0 : index
    %c0_6 = arith.constant 0 : index
    %c0_7 = arith.constant 0 : index
    %17 = vector.load %arg6[%16, %c0, %c0_6, %c0_7] : memref<2x1x8x256xbf16, #tpu.memory_space<vmem>>, vector<1x1x8x256xbf16>
    %18 = vector.shape_cast %17 : vector<1x1x8x256xbf16> to vector<8x256xbf16>
    %c0_8 = arith.constant 0 : index
    %c0_9 = arith.constant 0 : index
    %c0_10 = arith.constant 0 : index
    %c0_11 = arith.constant 0 : index
    %19 = vector.load %arg3[%c0_8, %c0_9, %c0_10, %c0_11] : memref<1x1x256x256xbf16, #tpu.memory_space<vmem>>, vector<1x1x256x256xbf16>
    %20 = vector.shape_cast %19 : vector<1x1x256x256xbf16> to vector<256x256xbf16>
    %cst_12 = arith.constant dense<0.000000e+00> : vector<8x256xf32>
    %21 = tpu.matmul %18, %20, %cst_12 {dimension_numbers = #tpu.dot_dimension_numbers<[1], [0], [0], [1], [0, 0, 1, 1], [], []>} : vector<8x256xbf16>, vector<256x256xbf16>, vector<8x256xf32> -> vector<8x256xf32>
    %22 = arith.addf %15, %21 : vector<8x256xf32>
    %c0_13 = arith.constant 0 : index
    %c0_14 = arith.constant 0 : index
    %c0_15 = arith.constant 0 : index
    %23 = vector.load %arg4[%c0_13, %c0_14, %c0_15] : memref<1x1x256xf32, #tpu.memory_space<vmem>>, vector<1x1x256xf32>
    %24 = vector.shape_cast %23 : vector<1x1x256xf32> to vector<1x256xf32>
    %25 = vector.broadcast %24 : vector<1x256xf32> to vector<8x256xf32>
    %26 = arith.addf %22, %25 : vector<8x256xf32>
    %cst_16 = arith.constant 0.000000e+00 : f32
    %27 = vector.broadcast %cst_16 : f32 to vector<8x256xf32>
    %28 = arith.maximumf %26, %27 : vector<8x256xf32>
    %29 = arith.truncf %28 : vector<8x256xf32> to vector<8x256xbf16>
    %c1_i32_17 = arith.constant 1 : i32
    %30 = arith.subi %c1_i32_17, %9 : i32
    %31 = arith.index_cast %30 : i32 to index
    %32 = arith.index_cast %arg1 : i32 to index
    %c0_18 = arith.constant 0 : index
    %c0_19 = arith.constant 0 : index
    %33 = vector.load %arg6[%31, %32, %c0_18, %c0_19] : memref<2x1x8x256xbf16, #tpu.memory_space<vmem>>, vector<1x1x8x256xbf16>
    %34 = vector.shape_cast %33 : vector<1x1x8x256xbf16> to vector<8x256xbf16>
    %35 = vector.shape_cast %29 : vector<8x256xbf16> to vector<1x1x8x256xbf16>
    tpu.vector_store %arg6[%31, %32, %c0_18, %c0_19], %35 {strides = array<i32>} : memref<2x1x8x256xbf16, #tpu.memory_space<vmem>>, vector<1x1x8x256xbf16>,
    %c2_i32_20 = arith.constant 2 : i32
    %36 = arith.cmpi eq, %arg0, %c2_i32_20 : i32
    %37 = arith.extui %36 : i1 to i32
    %c0_i32_21 = arith.constant 0 : i32
    %38 = arith.cmpi ne, %37, %c0_i32_21 : i32
    scf.if %38 {
      %c0_22 = arith.constant 0 : index
      %c0_23 = arith.constant 0 : index
      %39 = vector.load %arg5[%c0_22, %c0_23] : memref<8x256xf32, #tpu.memory_space<vmem>>, vector<8x256xf32>
      tpu.vector_store %arg5[%c0_22, %c0_23], %28 {strides = array<i32>} : memref<8x256xf32, #tpu.memory_space<vmem>>, vector<8x256xf32>,
    } else {
    }
    return
  }
  func.func @transform_0(%arg0: i32, %arg1: i32) -> (i32, i32) {
    %c0_i32 = arith.constant 0 : i32
    %c0_i32_0 = arith.constant 0 : i32
    %c0_i32_1 = arith.constant 0 : i32
    return %c0_i32, %c0_i32_0 : i32, i32
  }
  func.func @transform_1(%arg0: i32, %arg1: i32) -> (i32, i32, i32, i32) {
    %c0_i32 = arith.constant 0 : i32
    %c0_i32_0 = arith.constant 0 : i32
    %c0_i32_1 = arith.constant 0 : i32
    return %arg0, %arg1, %c0_i32, %c0_i32_0 : i32, i32, i32, i32
  }
  func.func @transform_2(%arg0: i32, %arg1: i32) -> (i32, i32, i32) {
    %c0_i32 = arith.constant 0 : i32
    %c0_i32_0 = arith.constant 0 : i32
    return %arg0, %c0_i32, %arg1 : i32, i32, i32
  }
  func.func @transform_3(%arg0: i32, %arg1: i32) -> (i32, i32) {
    %c2_i32 = arith.constant 2 : i32
    %0 = arith.cmpi eq, %arg0, %c2_i32 : i32
    %c0_i32 = arith.constant 0 : i32
    %1 = arith.select %0, %arg1, %c0_i32 : i32
    %c0_i32_0 = arith.constant 0 : i32
    %c0_i32_1 = arith.constant 0 : i32
    return %c0_i32_0, %1 : i32, i32
  }
}

</mosaic_0001>

<bundles_post_ra>
// kernel: _lambda_.1
= control target key start
LH: loop header
LB: loop body
LE: loop exit
PB: predicated region body
PF: predicated region fallthrough
CT: control target
= control target key end

     0   :  { %8 = vsyncpa [#allocation4], 0  ;;  %s1002_s0 = inlined_call_operand.vmem [shape: f32[8,256], index: 0, kind: input, shape index: {}]   ;;  %s1003_s1 = inlined_call_operand.vmem [shape: bf16[3,1,256,256], index: 1, kind: input, shape index: {}]   ;;  %s1004_s2 = inlined_call_operand.vmem [shape: f32[3,1,256], index: 2, kind: input, shape index: {}]   ;;  %s1005_s3 = inlined_call_operand.hbm [shape: f32[8,256], index: 3, kind: output, shape index: {}]  }
   0x1   :  { %10 = vsyncpa [#allocation4 + $0x1], 0  ;;  %s882_s12 = smov 0   ;;  %s884_s13 = smov 0  }
   0x2   :  { %s886_s14 = smov 0  }
   0x3 LB: > { %s658_s15 = sadd.s32 4294967295, %s859_s14   ;;  %s659_s16 = sadd.s32 4294967294, %s859_s14   ;;  %s859_s14 = sphi %s886_s14, %s16_s14   ;;  %s855_s13 = sphi %s884_s13, %s1008_s13   ;;  %s851_s12 = sphi %s882_s12, %s1007_s12  }
   0x4   : > { %s28_s17 = sadd.s32 1, %s855_s13  ;;  %p662_p0 = scmp.ge.s32.totalorder %s859_s14, 1 }
   0x5   : > { %p30_p1 = scmp.ge.s32.totalorder %s28_s17, 3  ;;  %p178_p2 = scmp.lt.s32.totalorder %s859_s14, 4 }
   0x7   : > { %s1010_s17 = smov (%p30_p1, %s28_s17), 0  ;;  %p179_p3 = pnand %p662_p0, %p178_p2 }
   0x8   : > { %p214_p4 = scmp.lt.s32.totalorder (!%p179_p3), %s851_s12, 2  ;;  %s236_s18 = ssub.s32 (!%p179_p3), 0, %s851_s12 }
   0x9   : > { %182 = sbr.rel (%p179_p3) target bundleno = 332 (0x14c), region = 32  ;;  %p247_p5 = scmp.eq.s32.totalorder (!%p179_p3), %s851_s12, 0 }
   0xa   : > { %p235_p6 = scmp.lt.s32.totalorder (!%p179_p3), %s851_s12, 0  ;;  %s666_s20 = smin.u32 (!%p179_p3), %s851_s12, %s236_s18 }
   0xb   : > { %s238_s29 = sand.u32 (!%p179_p3), 1, %s666_s20  }
   0xc   : > { %s239_s30 = ssub.s32 (!%p179_p3), 0, %s238_s29 }
  0x10   : > { %s215_s19 = scalar_select %p214_p4, %s851_s12, 2 }
  0x11   : > { %s1012_s30 = smov (!%p235_p6, %s239_s30), %s238_s29  ;;  %252 = sbr.rel (!%p247_p5) target bundleno = 24 (0x18), region = 36 }
  0x12   : > { %s715_s21 = sshll.u32 %s215_s19, 8  ;;  %s665_s22 = sshll.u32 %s215_s19, 1  ;;  %v253_v0 = vld [vmem:[%s1002_s0] sm:$0xff] (%p247_p5)  ;;  %v254_v1 = vld [vmem:[%s1002_s0 + $0x8] sm:$0xff] (%p247_p5) }
  0x13   : > { %s913_s25 = scalar_lea.vmem %s1003_s1, %s715_s21  ;;  %s918_s28 = scalar_lea.vmem %s1004_s2, %s665_s22  ;;  %v717_v2 = vpack.c.bf16 (%p247_p5), %v254_v1, %v253_v0 }
  0x14   : > { %p668_p7 = scmp.lt.s32.totalorder %s1012_s30, 0  ;;  %s245_s4 = sadd.s32 2, %s1012_s30 }
  0x15   : > { %263 = vst [vmem:[#allocation2] sm:$0xff] (%p247_p5), %v717_v2 }
  0x16   : > { %s1014_s4 = smov (!%p668_p7, %s245_s4), %s1012_s30 }
  0x18 PF: > { %v757_v3 = vld [vmem:[%s913_s25 + $0x4] ss:$8 sps:$4 sm:$0xff]   ;;  %v759_v4 = vld [vmem:[%s913_s25] ss:$8 sps:$4 sm:$0xff]   ;;  %v760_v5 = vld [vmem:[%s913_s25 + $0x14] ss:$8 sps:$4 sm:$0xff]   ;;  %v302_v38 = vlaneseq }
  0x19   : > { %479 = vmatprep.subr.bf16.mxu0 %v757_v3  ;;  %v762_v6 = vld [vmem:[%s913_s25 + $0x10] ss:$8 sps:$4 sm:$0xff]   ;;  %v763_v7 = vld [vmem:[%s913_s25 + $0x24] ss:$8 sps:$4 sm:$0xff]   ;;  %v765_v8 = vld [vmem:[%s913_s25 + $0x20] ss:$8 sps:$4 sm:$0xff]  }
  0x1a   : > { %480 = vmatpush1.bf16.msra.mxu0 %v759_v4  ;;  %v766_v9 = vld [vmem:[%s913_s25 + $0x34] ss:$8 sps:$4 sm:$0xff]   ;;  %v768_v10 = vld [vmem:[%s913_s25 + $0x30] ss:$8 sps:$4 sm:$0xff]   ;;  %v769_v11 = vld [vmem:[%s913_s25 + $0x44] ss:$8 sps:$4 sm:$0xff]  }
  0x1b   : > { %481 = vmatprep.subr.bf16.mxu0 %v760_v5  ;;  %v771_v12 = vld [vmem:[%s913_s25 + $0x40] ss:$8 sps:$4 sm:$0xff]   ;;  %s718_s9 = sshll.u32 %s1014_s4, 3  ;;  %v772_v13 = vld [vmem:[%s913_s25 + $0x54] ss:$8 sps:$4 sm:$0xff]   ;;  %v303_v39 = vshrl.u32 %v302_v38, 7 }
  0x1c   : > { %v774_v14 = vld [vmem:[%s913_s25 + $0x50] ss:$8 sps:$4 sm:$0xff]   ;;  %v775_v15 = vld [vmem:[%s913_s25 + $0x64] ss:$8 sps:$4 sm:$0xff]   ;;  %s266_s10 = scalar_lea.vmem [#allocation2], %s718_s9  ;;  %s524_s11 = ssub.s32 1, %s1014_s4 }
  0x1d   : > { %v267_v16 = vld [vmem:[%s266_s10] sm:$0xff]  ;;  %v778_v19 = vld [vmem:[%s913_s25 + $0x74] ss:$8 sps:$4 sm:$0xff]   ;;  %v780_v20 = vld [vmem:[%s913_s25 + $0x70] ss:$8 sps:$4 sm:$0xff]   ;;  %v304_v40 = vsub.s32 0, %v303_v39 }
  0x1e   : > { %482 = vmatpush1.bf16.msra.mxu0 %v762_v6  ;;  %v674_v17 = vcombine.high %v267_v16, %v267_v16  ;;  %v777_v18 = vld [vmem:[%s913_s25 + $0x60] ss:$8 sps:$4 sm:$0xff]   ;;  %v781_v21 = vld [vmem:[%s913_s25 + $0x84] ss:$8 sps:$4 sm:$0xff]   ;;  %v784_v23 = vld [vmem:[%s913_s25 + $0x94] ss:$8 sps:$4 sm:$0xff]   ;;  %v673_v37 = vcombine.low %v267_v16, %v267_v16 }
  0x1f   : > { %483 = vmatprep.subr.bf16.mxu0 %v763_v7  ;;  %v783_v22 = vld [vmem:[%s913_s25 + $0x80] ss:$8 sps:$4 sm:$0xff]   ;;  %v786_v24 = vld [vmem:[%s913_s25 + $0x90] ss:$8 sps:$4 sm:$0xff]   ;;  %v787_v25 = vld [vmem:[%s913_s25 + $0xa4] ss:$8 sps:$4 sm:$0xff]  }
  0x20   : > { %511 = vmatprep.mubr.bf16.mxu0 %v674_v17  ;;  %v789_v26 = vld [vmem:[%s913_s25 + $0xa0] ss:$8 sps:$4 sm:$0xff]   ;;  %v790_v27 = vld [vmem:[%s913_s25 + $0xb4] ss:$8 sps:$4 sm:$0xff]   ;;  %v792_v28 = vld [vmem:[%s913_s25 + $0xb0] ss:$8 sps:$4 sm:$0xff]  }
  0x21   : > { %v793_v29 = vld [vmem:[%s913_s25 + $0xc4] ss:$8 sps:$4 sm:$0xff]   ;;  %v795_v30 = vld [vmem:[%s913_s25 + $0xc0] ss:$8 sps:$4 sm:$0xff]   ;;  %v796_v31 = vld [vmem:[%s913_s25 + $0xd4] ss:$8 sps:$4 sm:$0xff]  }
  0x22   : > { %484 = vmatpush1.bf16.msra.mxu0 %v765_v8  ;;  %v798_v32 = vld [vmem:[%s913_s25 + $0xd0] ss:$8 sps:$4 sm:$0xff]   ;;  %v799_v33 = vld [vmem:[%s913_s25 + $0xe4] ss:$8 sps:$4 sm:$0xff]   ;;  %v801_v34 = vld [vmem:[%s913_s25 + $0xe0] ss:$8 sps:$4 sm:$0xff]  }
  0x23   : > { %485 = vmatprep.subr.bf16.mxu0 %v766_v9  ;;  %v802_v35 = vld [vmem:[%s913_s25 + $0xf4] ss:$8 sps:$4 sm:$0xff]   ;;  %v804_v36 = vld [vmem:[%s913_s25 + $0xf0] ss:$8 sps:$4 sm:$0xff]   ;;  %v300_v41 = vld [vmem:[%s918_s28] sm:$0x3] }
  0x24   : > { %v308_v42 = vsub.s32 1, %v303_v39  ;;  %v305_v43 = vrot.slane %v300_v41, %v304_v40  ;;  %s720_s18 = sshll.u32 %s524_s11, 3  ;;  %p710_p8 = scmp.ne.s32.totalorder %s851_s12, 2 }
  0x25   : > { %s535_s19 = scalar_lea.vmem [#allocation2], %s720_s18 }
  0x26   : > { %486 = vmatpush1.bf16.msra.mxu0 %v768_v10  ;;  %v309_v44 = vrot.slane %v300_v41, %v308_v42 }
  0x27   : > { %487 = vmatprep.subr.bf16.mxu0 %v769_v11 }
  0x2a   : > { %488 = vmatpush1.bf16.msra.mxu0 %v771_v12 }
  0x2b   : > { %489 = vmatprep.subr.bf16.mxu0 %v772_v13 }
  0x2e   : > { %490 = vmatpush1.bf16.msra.mxu0 %v774_v14 }
  0x2f   : > { %491 = vmatprep.subr.bf16.mxu0 %v775_v15 }
  0x32   : > { %492 = vmatpush1.bf16.msra.mxu0 %v777_v18 }
  0x33   : > { %493 = vmatprep.subr.bf16.mxu0 %v778_v19 }
  0x36   : > { %494 = vmatpush1.bf16.msra.mxu0 %v780_v20 }
  0x37   : > { %495 = vmatprep.subr.bf16.mxu0 %v781_v21 }
  0x3a   : > { %496 = vmatpush1.bf16.msra.mxu0 %v783_v22 }
  0x3b   : > { %497 = vmatprep.subr.bf16.mxu0 %v784_v23 }
  0x3e   : > { %498 = vmatpush1.bf16.msra.mxu0 %v786_v24 }
  0x3f   : > { %499 = vmatprep.subr.bf16.mxu0 %v787_v25 }
  0x42   : > { %500 = vmatpush1.bf16.msra.mxu0 %v789_v26 }
  0x43   : > { %501 = vmatprep.subr.bf16.mxu0 %v790_v27 }
  0x46   : > { %502 = vmatpush1.bf16.msra.mxu0 %v792_v28 }
  0x47   : > { %503 = vmatprep.subr.bf16.mxu0 %v793_v29 }
  0x4a   : > { %504 = vmatpush1.bf16.msra.mxu0 %v795_v30 }
  0x4b   : > { %505 = vmatprep.subr.bf16.mxu0 %v796_v31 }
  0x4e   : > { %506 = vmatpush1.bf16.msra.mxu0 %v798_v32 }
  0x4f   : > { %507 = vmatprep.subr.bf16.mxu0 %v799_v33 }
  0x52   : > { %508 = vmatpush1.bf16.msra.mxu0 %v801_v34 }
  0x53   : > { %509 = vmatprep.subr.bf16.mxu0 %v802_v35 }
  0x56   : > { %510 = vmatpush1.bf16.msra.mxu0 %v804_v36 }
  0x59   : > { %512 = vmatmul.mubr.bf16.vlgmr.msra.gmra.mrb[0].mxu0 %v673_v37 }
 0x12c   : > { %v513_v45 = vpop.f32.mrb[0].mxu0 }
 0x12d   : > { %v514_v46 = vadd.f32 %v513_v45, %v305_v43  ;;  %v515_v47 = vpop.f32.mrb[1].mxu0 }
 0x12e   : > { %v516_v48 = vadd.f32 %v515_v47, %v309_v44  ;;  %v517_v49 = vpop.f32.mrb[2].mxu0  ;;  %540 = sbr.rel (%p710_p8) target bundleno = 309 (0x135), region = 40 }
 0x12f   : > { %v520_v50 = vmax.f32 %v514_v46, 0.0  ;;  %v518_v51 = vpop.f32.mrb[3].mxu0 }
 0x130   : > { %v521_v52 = vmax.f32 %v516_v48, 0.0 }
 0x131   : > { %541 = vst [vmem:[#allocation3] sm:$0xff] (!%p710_p8), %v520_v50 }
 0x132   : > { %v719_v53 = vpack.c.bf16 %v521_v52, %v520_v50  ;;  %542 = vst [vmem:[#allocation3 + $0x8] sm:$0xff] (!%p710_p8), %v521_v52 }
 0x134   : > { %536 = vst [vmem:[%s535_s19] sm:$0xff] %v719_v53 }
 0x135 PF: > { %p968_p9 = scmp.eq.s32.totalorder %s658_s15, 2  ;;  %s861_s21 = smov [#allocation3]  }
 0x136   : > { %s560_s22 = sshll.u32 %s861_s21, 4  ;;  %s561_s22 = int_to_ptr.vmem [resolvable:$true] %s560_s22 }
 0x137   : > { %s807_s23 = scalar_lea.vmem %s561_s22, 256  ;;  %s813_s12 = scalar_lea.vmem %s561_s22, 512 }
 0x138   : > { %p808_p10 = scmp.ne.s32.totalorder %s561_s22, %s807_s23  ;;  %p814_p13 = scmp.lt.s32.totalorder %s561_s22, %s561_s22 }
 0x139   : > { %p815_p0 = scmp.lt.s32.totalorder %s813_s12, %s807_s23 }
 0x13a   : > { %p809_p11 = pnand %p808_p10, %p968_p9 }
 0x13b   : > { %p816_p1 = por %p815_p0, %p814_p13 }
 0x13c   : > { %p810_p12 = pneg %p809_p11 }
 0x13e   : > { %p817_p2 = pnand %p816_p1, %p810_p12 }
 0x140   : > { %820 = shalt.err (!%p817_p2)
}
 0x141   : > { %s821_s25 = scalar_lea.hbm %s1005_s3, 256 }
 0x142   : > { %p822_p3 = scmp.ne.s32.totalorder %s1005_s3, %s821_s25  ;;  %p827_p6 = scmp.lt.u32.totalorder %s821_s25, %s1005_s3 }
 0x144   : > { %p823_p4 = pnand %p822_p3, %p968_p9 }
 0x146   : > { %p824_p5 = pneg %p823_p4 }
 0x148   : > { %p829_p7 = pnand %p827_p6, %p824_p5 }
 0x14a   : > { %832 = shalt.err (!%p829_p7)
}
 0x14b   : > { %722 = dma.vmem_to_hbm [thread:$0]  (%p968_p9), %s561_s22, 256, %s1005_s3, [#allocation4]  }
 0x14c PF: > { %p730_p8 = scmp.ge.s32.totalorder %s859_s14, 2  ;;  %p731_p10 = scmp.eq.s32.totalorder %s659_s16, 2 }
 0x14e   : > { %p726_p11 = pnand %p731_p10, %p730_p8 }
 0x150   : > { %846 = dma.done.wait (!%p726_p11), [#allocation4], 256  }
 0x151   : > { %848 = vsyncadd (!%p726_p11), [#allocation4], 4294967040  ;;  %s16_s14 = sadd.s32 1, %s859_s14   ;;  %s1007_s12 = smov %s855_s13 }
 0x152   : > { %p13_p12 = scmp.ge.s32.totalorder %s16_s14, 5   ;;  %s1008_s13 = smov %s1010_s17 }
 0x154   :  { %15 = sbr.rel (!%p13_p12) target bundleno = 3 (0x3), region = 80 }
 0x15b   :  { %578 = vsyncpa [#allocation4], 1 }
 0x15c   :  { %580 = vsyncpa [#allocation4 + $0x1], 1 }

</bundles_post_ra>
